<compile_context>
chip_gen: v6e
topology: v6e:2x2x1
jax: 0.10.0
libtpu: 0.0.40
codegen_flags: <defaults>
</compile_context>

<pallas_src>
import functools

import jax
import jax.numpy as jnp
from jax.experimental import pallas as pl
from jax.experimental.pallas import tpu as pltpu


# --------------------------------------------------------------------------------------
# Kernels
# --------------------------------------------------------------------------------------

def _ffn_resident_kernel(x_ref, w1_ref, b1_ref, w2_ref, b2_ref, o_ref, *, approximate):
    """Weights fully VMEM-resident; grid is over row tiles only.

    x_ref:(tm,D)  w1_ref:(D,H)  b1_ref:(1,H) f32  w2_ref:(H,D)  b2_ref:(1,D) f32  o_ref:(tm,D)
    """
    h = jnp.dot(x_ref[...], w1_ref[...], preferred_element_type=jnp.float32)
    h = h + b1_ref[...]
    h = jax.nn.gelu(h, approximate=approximate)
    out = jnp.dot(h.astype(w2_ref.dtype), w2_ref[...],
                  preferred_element_type=jnp.float32)
    o_ref[...] = (out + b2_ref[...]).astype(o_ref.dtype)


def _ffn_stream_kernel(x_ref, w1_ref, b1_ref, w2_ref, b2_ref, o_ref, acc_ref, *,
                       approximate):
    """Hidden dim streamed in th-wide tiles on the last ("arbitrary") grid axis.

    x_ref:(tm,D)  w1_ref:(D,th)  b1_ref:(1,th) f32  w2_ref:(th,D)  b2_ref:(1,D) f32
    o_ref:(tm,D)  acc_ref:(tm,D) f32 scratch, resident across the hidden (j) axis.
    """
    j = pl.program_id(1)

    @pl.when(j == 0)
    def _init():
        # Fuse the second bias into the accumulator init (one broadcast per row tile).
        acc_ref[...] = jnp.zeros_like(acc_ref) + b2_ref[...]

    h = jnp.dot(x_ref[...], w1_ref[...], preferred_element_type=jnp.float32)
    h = h + b1_ref[...]
    h = jax.nn.gelu(h, approximate=approximate)
    acc_ref[...] += jnp.dot(h.astype(w2_ref.dtype), w2_ref[...],
                            preferred_element_type=jnp.float32)

    @pl.when(j == pl.num_programs(1) - 1)
    def _finalize():
        o_ref[...] = acc_ref[...].astype(o_ref.dtype)


# --------------------------------------------------------------------------------------
# Tile / VMEM sizing helpers
# --------------------------------------------------------------------------------------

def _round_up(x, m):
    return ((x + m - 1) // m) * m


def _cdiv(a, b):
    return -(-a // b)


def _pick_tile(total, want, aligns=(256, 128)):
    """Largest multiple of an alignment dividing `total` and <= `want`.

    Prefers 256-alignment (v6e/v7x 2x256^2 MXU), falls back to 128 (lane width / v5e),
    then to the full extent."""
    if total <= want:
        return total
    for a in aligns:
        best = None
        t = a
        while t <= want:
            if total % t == 0:
                best = t
            t += a
        if best is not None:
            return best
    return total


def _vmem_capacity_bytes():
    """Per-core VMEM capacity (128 MiB v5e/v6e, 64 MiB v7x); conservative fallback."""
    try:
        cap = getattr(pltpu.get_tpu_info(), "vmem_capacity_bytes", None)
        if cap:
            return int(cap)
    except Exception:
        pass
    return 64 * 1024 * 1024


def _resident_vmem_bytes(tm, D, H, w_itemsize):
    io = 2 * tm * D * w_itemsize + 2 * tm * D * 4        # x + out (double-buffered)
    w = 2 * 2 * D * H * w_itemsize + 2 * (H + D) * 4     # W1 + W2 (+ f32 biases)
    inter = 2 * tm * H * 4 + tm * D * 4                  # f32 GELU intermediate + epilogue
    return io + w + inter


def _stream_vmem_bytes(tm, th, D, w_itemsize):
    io = 2 * tm * D * w_itemsize + 2 * tm * D * 4        # x + out (double-buffered)
    w = 2 * 2 * D * th * w_itemsize + 2 * (th + D) * 4   # streamed W1/W2 tiles (+ biases)
    acc = tm * D * 4                                     # f32 accumulator scratch
    inter = 2 * tm * th * 4                              # f32 GELU intermediate
    return io + w + acc + inter


# --------------------------------------------------------------------------------------
# Wrapper
# --------------------------------------------------------------------------------------

def feed_forward(x, w1, b1, w2, b2, *, tm=None, th=None,
                 compute_dtype=jnp.bfloat16, gelu_approximate=True,
                 force_stream=False, vmem_budget_bytes=None, vmem_limit_bytes=None):
    """x: (B, S, D) -> (B, S, D). Dropout p=0.0 -> identity (inference)."""
    B, S, D = x.shape
    H = w1.shape[1]
    rows = B * S
    out_dtype = x.dtype
    out_itemsize = jnp.dtype(out_dtype).itemsize
    w_itemsize = jnp.dtype(compute_dtype).itemsize

    cap = _vmem_capacity_bytes()
    if vmem_budget_bytes is None:
        vmem_budget_bytes = int(cap * 0.70)   # headroom for Mosaic internal scratch
    if vmem_limit_bytes is None:
        vmem_limit_bytes = int(cap * 0.85)    # ~110 MiB on v5e/v6e, ~54 MiB on v7x

    row_align = 16 if w_itemsize < 4 else 8   # bf16 packs 2 rows per sublane
    if tm is None:
        tm = 512
    tm_eff = min(_round_up(tm, row_align), _round_up(rows, row_align))

    use_resident = (not force_stream) and (
        _resident_vmem_bytes(row_align, D, H, w_itemsize) <= vmem_budget_bytes)

    if use_resident:
        # Weights are read from HBM once; shrink only the row tile if activations overflow.
        while (_resident_vmem_bytes(tm_eff, D, H, w_itemsize) > vmem_budget_bytes
               and tm_eff > row_align):
            tm_eff = max(row_align, _round_up(tm_eff // 2, row_align))
        th_eff = H
    else:
        if th is None:
            th = 512
        th_eff = _pick_tile(H, th)
        # Shrink th first (weight HBM re-streaming scales as rows/tm, so keep tm large);
        # tm only as a last resort.
        while _stream_vmem_bytes(tm_eff, th_eff, D, w_itemsize) > vmem_budget_bytes:
            if th_eff > 128:
                new_th = _pick_tile(H, th_eff // 2)
                if new_th < th_eff:
                    th_eff = new_th
                    continue
            if tm_eff > row_align:
                tm_eff = max(row_align, _round_up(tm_eff // 2, row_align))
                continue
            break

    # v7x has 2 TensorCores: ensure the "parallel" row axis has >= 2 tiles to shard.
    if rows >= 2 * row_align and _round_up(rows, tm_eff) // tm_eff < 2:
        tm_eff = _round_up(_cdiv(rows, 2), row_align)

    rows_p = _round_up(rows, tm_eff)
    n_row_tiles = rows_p // tm_eff

    x2d = x.reshape(rows, D).astype(compute_dtype)
    if rows_p != rows:
        x2d = jnp.pad(x2d, ((0, rows_p - rows), (0, 0)))
    w1c = w1.astype(compute_dtype)
    w2c = w2.astype(compute_dtype)
    b1f = b1.reshape(1, H).astype(jnp.float32)
    b2f = b2.reshape(1, D).astype(jnp.float32)

    weight_reads = 1 if use_resident else n_row_tiles   # weights re-streamed per row tile
    cost = pl.CostEstimate(
        flops=4 * rows_p * D * H,                        # two (rows x D x H) matmuls
        transcendentals=rows_p * H,                      # one tanh/erf per hidden element
        bytes_accessed=(x2d.size * w_itemsize
                        + weight_reads * (w1c.size + w2c.size) * w_itemsize
                        + (b1f.size + b2f.size) * 4
                        + rows_p * D * out_itemsize))

    if use_resident:
        out2d = pl.pallas_call(
            functools.partial(_ffn_resident_kernel, approximate=gelu_approximate),
            out_shape=jax.ShapeDtypeStruct((rows_p, D), out_dtype),
            grid_spec=pltpu.PrefetchScalarGridSpec(
                num_scalar_prefetch=0,
                grid=(n_row_tiles,),
                in_specs=[
                    pl.BlockSpec((tm_eff, D), lambda i: (i, 0)),   # x row tile
                    pl.BlockSpec((D, H), lambda i: (0, 0)),        # W1 (VMEM-resident)
                    pl.BlockSpec((1, H), lambda i: (0, 0)),        # b1
                    pl.BlockSpec((H, D), lambda i: (0, 0)),        # W2 (VMEM-resident)
                    pl.BlockSpec((1, D), lambda i: (0, 0)),        # b2
                ],
                out_specs=pl.BlockSpec((tm_eff, D), lambda i: (i, 0)),
            ),
            compiler_params=pltpu.CompilerParams(
                dimension_semantics=("parallel",),
                vmem_limit_bytes=vmem_limit_bytes),
            cost_estimate=cost,
        )(x2d, w1c, b1f, w2c, b2f)
    else:
        grid = (n_row_tiles, H // th_eff)                # reduction (hidden) axis last
        out2d = pl.pallas_call(
            functools.partial(_ffn_stream_kernel, approximate=gelu_approximate),
            out_shape=jax.ShapeDtypeStruct((rows_p, D), out_dtype),
            grid_spec=pltpu.PrefetchScalarGridSpec(
                num_scalar_prefetch=0,
                grid=grid,
                # NOTE: if profiling shows exposed DMA on the streamed W1/W2 tiles,
                # add pipeline_mode=pl.Buffered(3) to these two specs (VMEM permitting).
                in_specs=[
                    pl.BlockSpec((tm_eff, D), lambda i, j: (i, 0)),   # x (resident over j)
                    pl.BlockSpec((D, th_eff), lambda i, j: (0, j)),   # W1 column tile
                    pl.BlockSpec((1, th_eff), lambda i, j: (0, j)),   # b1 tile
                    pl.BlockSpec((th_eff, D), lambda i, j: (j, 0)),   # W2 row tile
                    pl.BlockSpec((1, D), lambda i, j: (0, 0)),        # b2 (constant)
                ],
                out_specs=pl.BlockSpec((tm_eff, D), lambda i, j: (i, 0)),
                scratch_shapes=[pltpu.VMEM((tm_eff, D), jnp.float32)],
            ),
            compiler_params=pltpu.CompilerParams(
                dimension_semantics=("parallel", "arbitrary"),
                vmem_limit_bytes=vmem_limit_bytes),
            cost_estimate=cost,
        )(x2d, w1c, b1f, w2c, b2f)

    if rows_p != rows:
        out2d = out2d[:rows]
    return out2d.reshape(B, S, D)


def _reference(x, w1, b1, w2, b2):
    h = jax.nn.gelu(jnp.dot(x, w1) + b1.reshape(1, -1), approximate=False)
    return jnp.dot(h, w2) + b2.reshape(1, -1)


if __name__ == "__main__":
    # Small but lane-dense shapes: batch=2, seq=16, dim=128, hidden=256.
    B, S, D, H = 2, 16, 128, 256
    key = jax.random.PRNGKey(0)
    kx, kw1, kb1, kw2, kb2 = jax.random.split(key, 5)

    x = jax.random.normal(kx, (B, S, D), dtype=jnp.float32)
    # Deterministic "Linear" parameter init (synthetic, not a checkpoint load).
    w1 = jax.random.normal(kw1, (D, H), dtype=jnp.float32) * (1.0 / D ** 0.5)
    b1 = jax.random.normal(kb1, (1, H), dtype=jnp.float32) * 0.01
    w2 = jax.random.normal(kw2, (H, D), dtype=jnp.float32) * (1.0 / H ** 0.5)
    b2 = jax.random.normal(kb2, (1, D), dtype=jnp.float32) * 0.01

    ref = _reference(x, w1, b1, w2, b2)

    # 1) Default fast path: bf16 matmuls + f32 accumulation, weights VMEM-resident,
    #    rows-only "parallel" grid (>= 2 row tiles). Loose tolerance for bf16/tanh-GELU.
    out_resident = jax.block_until_ready(feed_forward(x, w1, b1, w2, b2))
    assert out_resident.shape == (B, S, D)
    assert jnp.allclose(out_resident, ref, atol=4e-2, rtol=4e-2)

    # 2) Forced hidden-streaming path (small tiles) to exercise the reduction axis,
    #    the resident f32 accumulator and the pl.when init/finalize.
    out_stream = jax.block_until_ready(
        feed_forward(x, w1, b1, w2, b2, tm=16, th=128, force_stream=True))
    assert out_stream.shape == (B, S, D)
    assert jnp.allclose(out_stream, ref, atol=4e-2, rtol=4e-2)

    # 3) Exact-parity path (f32 compute, erf GELU) matching the PyTorch module numerics.
    out_exact = jax.block_until_ready(
        feed_forward(x, w1, b1, w2, b2, compute_dtype=jnp.float32,
                     gelu_approximate=False))
    assert jnp.allclose(out_exact, ref, atol=1e-4, rtol=1e-4)

    print("KERNEL_OK")
</pallas_src>

<mosaic_0001>
module attributes {stable_mosaic.version = 11 : i64} {
  func.func @_ffn_resident_kernel(%arg0: i32, %arg1: memref<16x128xbf16, #tpu.memory_space<vmem>>, %arg2: memref<128x256xbf16, #tpu.memory_space<vmem>>, %arg3: memref<1x256xf32, #tpu.memory_space<vmem>>, %arg4: memref<256x128xbf16, #tpu.memory_space<vmem>>, %arg5: memref<1x128xf32, #tpu.memory_space<vmem>>, %arg6: memref<16x128xf32, #tpu.memory_space<vmem>>) attributes {dimension_semantics = [#tpu.dimension_semantics<parallel>], iteration_bounds = array<i64: 2>, scalar_prefetch = 0 : i64, scratch_operands = 0 : i64, tpu.core_type = #tpu.core_type<tc>, window_params = [{transform_indices = @transform_0, window_bounds = array<i64: 16, 128>}, {pipeline_mode = #tpu.pipeline_mode<synchronous>, transform_indices = @transform_1, window_bounds = array<i64: 128, 256>}, {pipeline_mode = #tpu.pipeline_mode<synchronous>, transform_indices = @transform_2, window_bounds = array<i64: 1, 256>}, {pipeline_mode = #tpu.pipeline_mode<synchronous>, transform_indices = @transform_3, window_bounds = array<i64: 256, 128>}, {pipeline_mode = #tpu.pipeline_mode<synchronous>, transform_indices = @transform_4, window_bounds = array<i64: 1, 128>}, {transform_indices = @transform_5, window_bounds = array<i64: 16, 128>}]} {
    %c0 = arith.constant 0 : index
    %c0_0 = arith.constant 0 : index
    %0 = vector.load %arg1[%c0, %c0_0] : memref<16x128xbf16, #tpu.memory_space<vmem>>, vector<16x128xbf16>
    %c0_1 = arith.constant 0 : index
    %c0_2 = arith.constant 0 : index
    %1 = vector.load %arg2[%c0_1, %c0_2] : memref<128x256xbf16, #tpu.memory_space<vmem>>, vector<128x256xbf16>
    %cst = arith.constant dense<0.000000e+00> : vector<16x256xf32>
    %2 = tpu.matmul %0, %1, %cst {dimension_numbers = #tpu.dot_dimension_numbers<[1], [0], [0], [1], [0, 0, 1, 1], [], []>} : vector<16x128xbf16>, vector<128x256xbf16>, vector<16x256xf32> -> vector<16x256xf32>
    %c0_3 = arith.constant 0 : index
    %c0_4 = arith.constant 0 : index
    %3 = vector.load %arg3[%c0_3, %c0_4] : memref<1x256xf32, #tpu.memory_space<vmem>>, vector<1x256xf32>
    %4 = vector.broadcast %3 : vector<1x256xf32> to vector<16x256xf32>
    %5 = arith.addf %2, %4 : vector<16x256xf32>
    %6 = arith.mulf %5, %5 : vector<16x256xf32>
    %7 = arith.mulf %5, %6 : vector<16x256xf32>
    %cst_5 = arith.constant 4.471500e-02 : f32
    %8 = vector.broadcast %cst_5 : f32 to vector<16x256xf32>
    %9 = arith.mulf %8, %7 : vector<16x256xf32>
    %10 = arith.addf %5, %9 : vector<16x256xf32>
    %cst_6 = arith.constant 0.797884583 : f32
    %11 = vector.broadcast %cst_6 : f32 to vector<16x256xf32>
    %12 = arith.mulf %11, %10 : vector<16x256xf32>
    %13 = math.tanh %12 : vector<16x256xf32>
    %cst_7 = arith.constant 1.000000e+00 : f32
    %14 = vector.broadcast %cst_7 : f32 to vector<16x256xf32>
    %15 = arith.addf %14, %13 : vector<16x256xf32>
    %cst_8 = arith.constant 5.000000e-01 : f32
    %16 = vector.broadcast %cst_8 : f32 to vector<16x256xf32>
    %17 = arith.mulf %16, %15 : vector<16x256xf32>
    %18 = arith.mulf %5, %17 : vector<16x256xf32>
    %19 = arith.truncf %18 : vector<16x256xf32> to vector<16x256xbf16>
    %c0_9 = arith.constant 0 : index
    %c0_10 = arith.constant 0 : index
    %20 = vector.load %arg4[%c0_9, %c0_10] : memref<256x128xbf16, #tpu.memory_space<vmem>>, vector<256x128xbf16>
    %cst_11 = arith.constant dense<0.000000e+00> : vector<16x128xf32>
    %21 = tpu.matmul %19, %20, %cst_11 {dimension_numbers = #tpu.dot_dimension_numbers<[1], [0], [0], [1], [0, 0, 1, 1], [], []>} : vector<16x256xbf16>, vector<256x128xbf16>, vector<16x128xf32> -> vector<16x128xf32>
    %c0_12 = arith.constant 0 : index
    %c0_13 = arith.constant 0 : index
    %22 = vector.load %arg5[%c0_12, %c0_13] : memref<1x128xf32, #tpu.memory_space<vmem>>, vector<1x128xf32>
    %23 = vector.broadcast %22 : vector<1x128xf32> to vector<16x128xf32>
    %24 = arith.addf %21, %23 : vector<16x128xf32>
    %c0_14 = arith.constant 0 : index
    %c0_15 = arith.constant 0 : index
    %25 = vector.load %arg6[%c0_14, %c0_15] : memref<16x128xf32, #tpu.memory_space<vmem>>, vector<16x128xf32>
    tpu.vector_store %arg6[%c0_14, %c0_15], %24 {strides = array<i32>} : memref<16x128xf32, #tpu.memory_space<vmem>>, vector<16x128xf32>,
    return
  }
  func.func @transform_0(%arg0: i32) -> (i32, i32) {
    %c0_i32 = arith.constant 0 : i32
    %c0_i32_0 = arith.constant 0 : i32
    return %arg0, %c0_i32 : i32, i32
  }
  func.func @transform_1(%arg0: i32) -> (i32, i32) {
    %c0_i32 = arith.constant 0 : i32
    %c0_i32_0 = arith.constant 0 : i32
    %c0_i32_1 = arith.constant 0 : i32
    return %c0_i32, %c0_i32_0 : i32, i32
  }
  func.func @transform_2(%arg0: i32) -> (i32, i32) {
    %c0_i32 = arith.constant 0 : i32
    %c0_i32_0 = arith.constant 0 : i32
    %c0_i32_1 = arith.constant 0 : i32
    return %c0_i32, %c0_i32_0 : i32, i32
  }
  func.func @transform_3(%arg0: i32) -> (i32, i32) {
    %c0_i32 = arith.constant 0 : i32
    %c0_i32_0 = arith.constant 0 : i32
    %c0_i32_1 = arith.constant 0 : i32
    return %c0_i32, %c0_i32_0 : i32, i32
  }
  func.func @transform_4(%arg0: i32) -> (i32, i32) {
    %c0_i32 = arith.constant 0 : i32
    %c0_i32_0 = arith.constant 0 : i32
    %c0_i32_1 = arith.constant 0 : i32
    return %c0_i32, %c0_i32_0 : i32, i32
  }
  func.func @transform_5(%arg0: i32) -> (i32, i32) {
    %c0_i32 = arith.constant 0 : i32
    %c0_i32_0 = arith.constant 0 : i32
    return %arg0, %c0_i32 : i32, i32
  }
}

</mosaic_0001>

<bundles_post_ra>
// kernel: tpu_custom_call.1
= control target key start
LH: loop header
LB: loop body
LE: loop exit
PB: predicated region body
PF: predicated region fallthrough
CT: control target
= control target key end

     0   :  { %10 = vsyncpa [#allocation3], 0  ;;  %s1350_s0 = inlined_call_operand.hbm [shape: bf16[32,128], index: 0, kind: input, shape index: {}]   ;;  %s1351_s1 = inlined_call_operand.hbm [shape: bf16[128,256], index: 1, kind: input, shape index: {}]   ;;  %s1352_s2 = inlined_call_operand.vmem [shape: f32[1,256], index: 2, kind: input, shape index: {}]   ;;  %s1353_s3 = inlined_call_operand.hbm [shape: bf16[256,128], index: 3, kind: input, shape index: {}]   ;;  %s1354_s4 = inlined_call_operand.vmem [shape: f32[1,128], index: 4, kind: input, shape index: {}]   ;;  %s1355_s5 = inlined_call_operand.hbm [shape: f32[32,128], index: 5, kind: output, shape index: {}]  }
   0x1   :  { %12 = vsyncpa [#allocation3 + $0x1], 0 }
   0x2   :  { %13 = vsyncpa [#allocation6], 0 }
   0x3   :  { %14 = vsyncpa [#allocation4], 0 }
   0x4   :  { %16 = vsyncpa [#allocation4 + $0x1], 0  ;;  %s1146_s18 = smov 0   ;;  %s1148_s19 = smov 0  }
   0x5   :  { %s1150_s20 = smov 0   ;;  %s1152_s21 = smov 0  }
   0x6 LB: > { %s1167_s22 = sadd.s32 4294967295, %s1103_s21   ;;  %s756_s23 = sadd.s32 4294967294, %s1103_s21   ;;  %s1103_s21 = sphi %s1152_s21, %s1379_s21   ;;  %s1099_s20 = sphi %s1150_s20, %s1378_s20   ;;  %s1095_s19 = sphi %s1148_s19, %s1377_s19   ;;  %s1091_s18 = sphi %s1146_s18, %s1376_s18  }
   0x7   : > { %p42_p0 = scmp.ne.s32.totalorder %s1095_s19, %s1091_s18  ;;  %p1356_p1 = scmp.eq.s32.totalorder %s1167_s22, 0 }
   0x8   : > { %p156_p3 = scmp.eq.s32.totalorder %s756_s23, 1  ;;  %p757_p5 = scmp.ge.s32.totalorder %s1103_s21, 1 }
   0x9   : > { %p1176_p4 = por %p1356_p1, %p42_p0  ;;  %p163_p7 = scmp.lt.s32.totalorder %s1103_s21, 3 }
   0xa   : > { %p1181_p6 = por %p156_p3, %p42_p0  ;;  %s1105_s27 = smov [#allocation5]  }
   0xb   : > { %s1361_s24 = scalar_select %p1176_p4, 1, 0 }
   0xc   : > { %s1362_s25 = scalar_select %p1181_p6, 1, 0 }
   0xd   : > { %p1186_p8 = pnand %p757_p5, %p163_p7  ;;  %s175_s28 = sshll.u32 %s1105_s27, 4  ;;  %s176_s28 = int_to_ptr.vmem [resolvable:$true] %s175_s28 }
   0xe   : > { %s1106_s30 = smov [#allocation7]   ;;  %s966_s7 = scalar_lea.vmem %s176_s28, 2048 }
   0xf   : > { %s1363_s26 = scalar_select %p1186_p8, 1, 0 }
  0x10   : > { %p844_p9 = pneg %p1186_p8  ;;  %s191_s6 = sshll.u32 %s1106_s30, 4  ;;  %s192_s6 = int_to_ptr.vmem [resolvable:$true] %s191_s6 }
  0x11   : > { %p967_p13 = scmp.ne.s32.totalorder %s176_s28, %s966_s7  ;;  %p974_p5 = scmp.lt.s32.totalorder %s176_s28, %s176_s28 }
  0x12   : > { %p1195_p11 = pnand %p844_p9, %p1356_p1  ;;  %p975_p7 = scmp.lt.s32.totalorder %s966_s7, %s966_s7 }
  0x14   : > { %p957_p12 = pneg %p1195_p11  ;;  %p976_p10 = por %p975_p7, %p974_p5 }
  0x16   : > { %p969_p0 = pnand %p967_p13, %p957_p12 }
  0x18   : > { %p970_p3 = pneg %p969_p0 }
  0x1a   : > { %p977_p9 = pnand %p976_p10, %p970_p3 }
  0x1c   : > { %980 = shalt.err (!%p977_p9)
}
  0x1d   : > { %s1107_s8 = smov 128   ;;  %s1108_s9 = smov 8  }
  0x1e   : > { %847 = dma.hbm_to_vmem [thread:$0]  (!%p1195_p11), %s1351_s1, 2048, %s176_s28, [#allocation6], %s1107_s8, %s1107_s8, %s1108_s9  }
  0x1f   : > { %s992_s12 = scalar_lea.vmem %s192_s6, 2048  ;;  %p1000_p2 = scmp.lt.s32.totalorder %s192_s6, %s192_s6 }
  0x20   : > { %p993_p1 = scmp.ne.s32.totalorder %s192_s6, %s992_s12  ;;  %p1001_p6 = scmp.lt.s32.totalorder %s992_s12, %s992_s12 }
  0x22   : > { %p995_p13 = pnand %p993_p1, %p957_p12  ;;  %p1002_p5 = por %p1001_p6, %p1000_p2 }
  0x24   : > { %p996_p0 = pneg %p995_p13 }
  0x26   : > { %p1003_p10 = pnand %p1002_p5, %p996_p0 }
  0x28   : > { %1006 = shalt.err (!%p1003_p10)
}
  0x29   : > { %s1357_s13 = smov 64   ;;  %s1110_s14 = smov 4  }
  0x2a   : > { %850 = dma.hbm_to_vmem [thread:$0]  (!%p1195_p11), %s1353_s3, 2048, %s192_s6, [#allocation6], %s1357_s13, %s1357_s13, %s1110_s14  }
  0x2b   : > { %s1221_s17 = sadd.s32 1, %s1103_s21   ;;  %s29_s27 = sadd.s32 1, %s1099_s20 }
  0x2c   : > { %s26_s23 = ssub.s32 %s1103_s21, %s1221_s17  ;;  %p36_p2 = scmp.ne.s32.totalorder %s1099_s20, %s1095_s19 }
  0x2d   : > { %p27_p1 = scmp.eq.s32.totalorder %s26_s23, 0  ;;  %p37_p6 = scmp.eq.s32.totalorder %s1103_s21, 0 }
  0x2e   : > { %p1365_p3 = scmp.eq.s32.totalorder %s1167_s22, 1  ;;  %p861_p9 = scmp.lt.s32.totalorder %s1103_s21, 2 }
  0x2f   : > { %s1230_s28 = scalar_select %p27_p1, %s1099_s20, %s29_s27  }
  0x30   : > { %p38_p12 = por %p37_p6, %p36_p2  ;;  %p1234_p7 = por %p1365_p3, %p36_p2 }
  0x31   : > { %s208_s30 = sand.u32 1, %s1099_s20   ;;  %s808_s6 = sshll.u32 %s1103_s21, 7 }
  0x32   : > { %s1366_s29 = scalar_select %p1234_p7, 1, 0 }
  0x33   : > { %s761_s7 = sshll.u32 %s208_s30, 3  ;;  %s1244_s10 = scalar_lea.hbm %s1350_s0, %s808_s6 }
  0x34   : > { %s212_s11 = scalar_lea.vmem [#allocation2], %s761_s7  ;;  %p1248_p11 = pnand %p861_p9, %p38_p12 }
  0x35   : > { %s219_s12 = sshll.u32 %s212_s11, 4  ;;  %s1252_s16 = scalar_lea.sflag [#allocation3], %s208_s30  ;;  %s1246_s12 = int_to_ptr.vmem [resolvable:$true] %s219_s12 }
  0x36   : > { %s1007_s23 = scalar_lea.hbm %s1244_s10, 128  ;;  %p1009_p0 = pneg %p1248_p11 }
  0x37   : > { %p1008_p13 = scmp.ne.s32.totalorder %s1244_s10, %s1007_s23  ;;  %s1012_s7 = scalar_lea.hbm %s1350_s0, 256 }
  0x38   : > { %p1013_p1 = scmp.lt.s32.totalorder %s1244_s10, %s1350_s0  ;;  %p1014_p2 = scmp.lt.s32.totalorder %s1012_s7, %s1007_s23 }
  0x39   : > { %p1010_p5 = pnand %p1009_p0, %p1008_p13 }
  0x3a   : > { %p1015_p6 = por %p1014_p2, %p1013_p1 }
  0x3b   : > { %p1011_p10 = pneg %p1010_p5 }
  0x3d   : > { %p1016_p12 = pnand %p1015_p6, %p1011_p10 }
  0x3f   : > { %1019 = shalt.err (!%p1016_p12)
}
  0x40   : > { %s1020_s30 = scalar_lea.vmem %s1246_s12, 128  ;;  %s1111_s11 = smov [#allocation2]  }
  0x41   : > { %p1021_p3 = scmp.ne.s32.totalorder %s1246_s12, %s1020_s30  ;;  %s1025_s13 = sshll.u32 %s1111_s11, 4  ;;  %s1026_s13 = int_to_ptr.vmem [resolvable:$false] %s1025_s13 }
  0x42   : > { %s1027_s27 = scalar_lea.vmem %s1026_s13, 256  ;;  %p1028_p5 = scmp.lt.s32.totalorder %s1246_s12, %s1026_s13 }
  0x43   : > { %p1023_p9 = pnand %p1021_p3, %p1009_p0  ;;  %p1029_p7 = scmp.lt.s32.totalorder %s1027_s27, %s1020_s30 }
  0x45   : > { %p1024_p13 = pneg %p1023_p9  ;;  %p1030_p4 = por %p1029_p7, %p1028_p5 }
  0x47   : > { %p1031_p8 = pnand %p1030_p4, %p1024_p13 }
  0x49   : > { %1034 = shalt.err (!%p1031_p8)
}
  0x4a   : > { %s1368_s23 = smov 64   ;;  %p1369_p0 = scmp.ne.s32.totalorder %s1363_s26, 0 }
  0x4b   : > { %854 = dma.hbm_to_vmem [thread:$0]  (!%p1248_p11), %s1244_s10, 128, %s1246_s12, %s1252_s16, %s1368_s23, %s1368_s23, %s1110_s14  }
  0x4c   : > { %231 = sbr.rel (%p1369_p0) target bundleno = 569 (0x239), region = 40  ;;  %s1279_s6 = sand.u32 (!%p1369_p0), 1, %s1095_s19  }
  0x4d   : > { %s765_s13 = sshll.u32 (!%p1369_p0), %s1279_s6, 3  ;;  %s234_s7 = scalar_lea.sflag (!%p1369_p0), [#allocation3], %s1279_s6 }
  0x4e   : > { %s1283_s8 = scalar_lea.vmem (!%p1369_p0), [#allocation2], %s765_s13  ;;  %p1370_p4 = scmp.ne.s32.totalorder (!%p1369_p0), %s1361_s24, 0 }
  0x51   : > { %1078 = dma.done.wait (%p1370_p4), %s234_s7, 128  }
  0x52   : > { %1080 = vsyncadd (%p1370_p4), %s234_s7, 4294967168  ;;  %p1371_p8 = scmp.eq.s32.totalorder %s1167_s22, 0 }
  0x54   : > { %1082 = dma.done.wait (%p1371_p8), [#allocation6], 4096   ;;  %p1372_p7 = pmov %p1371_p8 }
  0x55   : > { %v1112_v0 = vmov 0   ;;  %v906_v1 = vld [vmem:[#allocation5 + $0x74] ss:$8 sps:$4 sm:$0xff]   ;;  %v908_v2 = vld [vmem:[#allocation5 + $0x70] ss:$8 sps:$4 sm:$0xff]   ;;  %v935_v22 = vld [vmem:[#allocation7 + $0x68] sm:$0xff]   ;;  %v295_v34 = vlaneseq }
  0x56   : > { %1084 = vsyncadd (%p1372_p7), [#allocation6], 4294963200  ;;  %423 = vmatprep.mubr.bf16.mxu0 %v1112_v0  ;;  %391 = vmatprep.subr.bf16.mxu0 %v906_v1  ;;  %v909_v3 = vld [vmem:[#allocation5 + $0x64] ss:$8 sps:$4 sm:$0xff]   ;;  %v911_v4 = vld [vmem:[#allocation5 + $0x60] ss:$8 sps:$4 sm:$0xff]  }
  0x57   : > { %392 = vmatpush1.bf16.msra.mxu0 %v908_v2  ;;  %v912_v5 = vld [vmem:[#allocation5 + $0x54] ss:$8 sps:$4 sm:$0xff]   ;;  %v914_v6 = vld [vmem:[#allocation5 + $0x50] ss:$8 sps:$4 sm:$0xff]   ;;  %v915_v7 = vld [vmem:[#allocation5 + $0x44] ss:$8 sps:$4 sm:$0xff]  }
  0x58   : > { %393 = vmatprep.subr.bf16.mxu0 %v909_v3  ;;  %v917_v8 = vld [vmem:[#allocation5 + $0x40] ss:$8 sps:$4 sm:$0xff]   ;;  %v918_v9 = vld [vmem:[#allocation5 + $0x34] ss:$8 sps:$4 sm:$0xff]   ;;  %v920_v10 = vld [vmem:[#allocation5 + $0x30] ss:$8 sps:$4 sm:$0xff]  }
  0x59   : > { %v921_v11 = vld [vmem:[#allocation5 + $0x24] ss:$8 sps:$4 sm:$0xff]   ;;  %v923_v12 = vld [vmem:[#allocation5 + $0x20] ss:$8 sps:$4 sm:$0xff]   ;;  %v924_v13 = vld [vmem:[#allocation5 + $0x14] ss:$8 sps:$4 sm:$0xff]  }
  0x5a   : > { %v926_v14 = vld [vmem:[#allocation5 + $0x10] ss:$8 sps:$4 sm:$0xff]   ;;  %v927_v15 = vld [vmem:[#allocation5 + $0x4] ss:$8 sps:$4 sm:$0xff]   ;;  %v929_v16 = vld [vmem:[#allocation5] ss:$8 sps:$4 sm:$0xff]  }
  0x5b   : > { %394 = vmatpush1.bf16.msra.mxu0 %v911_v4  ;;  %v930_v17 = vld [vmem:[%s1283_s8] sm:$0xff]   ;;  %v936_v23 = vld [vmem:[#allocation7 + $0x28] sm:$0xff]   ;;  %v937_v24 = vld [vmem:[#allocation7 + $0x60] sm:$0xff]   ;;  %v296_v35 = vshrl.u32 %v295_v34, 7  ;;  %s768_s14 = sshll.u32 %s1279_s6, 4  ;;  %s809_s9 = sshll.u32 %s1167_s22, 8 }
  0x5c   : > { %395 = vmatprep.subr.bf16.mxu0 %v912_v5  ;;  %v931_v18 = vld [vmem:[#allocation7 + $0x78] sm:$0xff]   ;;  %v933_v20 = vld [vmem:[#allocation7 + $0x70] sm:$0xff]   ;;  %v938_v25 = vld [vmem:[#allocation7 + $0x20] sm:$0xff]   ;;  %s271_s15 = scalar_lea.vmem [#allocation8], %s768_s14  ;;  %s1307_s27 = scalar_lea.hbm %s1355_s5, %s809_s9 }
  0x5d   : > { %v932_v19 = vld [vmem:[#allocation7 + $0x38] sm:$0xff]   ;;  %810 = vmatprep.subr.bf16.mxu1 %v931_v18  ;;  %v934_v21 = vld [vmem:[#allocation7 + $0x30] sm:$0xff]   ;;  %v943_v30 = vld [vmem:[#allocation7 + $0x48] sm:$0xff]   ;;  %v297_v36 = vsub.s32 0, %v296_v35  ;;  %v301_v38 = vsub.s32 1, %v296_v35  ;;  %s664_s16 = sshll.u32 %s271_s15, 4  ;;  %s1302_s16 = int_to_ptr.vmem [resolvable:$true] %s664_s16 }
  0x5e   : > { %811 = vmatpush3.bf16.msra.mxu1 %v932_v19  ;;  %v939_v26 = vld [vmem:[#allocation7 + $0x58] sm:$0xff]   ;;  %v941_v28 = vld [vmem:[#allocation7 + $0x50] sm:$0xff]   ;;  %v944_v31 = vld [vmem:[#allocation7 + $0x8] sm:$0xff]   ;;  %s651_s23 = scalar_lea.sflag [#allocation4], %s1279_s6  ;;  %s1035_s13 = scalar_lea.vmem %s1302_s16, 256 }
  0x5f   : > { %396 = vmatpush1.bf16.msra.mxu0 %v914_v6  ;;  %812 = vmatprep.subr.bf16.mxu1 %v933_v20  ;;  %v940_v27 = vld [vmem:[#allocation7 + $0x18] sm:$0xff]   ;;  %v942_v29 = vld [vmem:[#allocation7 + $0x10] sm:$0xff]   ;;  %v945_v32 = vld [vmem:[#allocation7 + $0x40] sm:$0xff]   ;;  %p1036_p11 = scmp.ne.s32.totalorder %s1302_s16, %s1035_s13  ;;  %p1373_p10 = scmp.ne.s32.totalorder %s1366_s29, 0 }
  0x60   : > { %397 = vmatprep.subr.bf16.mxu0 %v915_v7  ;;  %v946_v33 = vld [vmem:[#allocation7] sm:$0xff]   ;;  %v293_v37 = vld [vmem:[%s1352_s2] sm:$0x3]  ;;  %s1113_s22 = smov [#allocation8]  }
  0x61   : > { %v298_v39 = vrot.slane %v293_v37, %v297_v36  ;;  %v302_v40 = vrot.slane %v293_v37, %v301_v38  ;;  %p1037_p1 = pnand %p1036_p11, %p1373_p10  ;;  %s1039_s7 = sshll.u32 %s1113_s22, 4  ;;  %s1040_s7 = int_to_ptr.vmem [resolvable:$false] %s1039_s7 }
  0x62   : > { %813 = vmatpush3.bf16.msra.mxu1 %v934_v21  ;;  %s1041_s8 = scalar_lea.vmem %s1040_s7, 512  ;;  %p1042_p6 = scmp.lt.s32.totalorder %s1302_s16, %s1040_s7 }
  0x63   : > { %398 = vmatpush1.bf16.msra.mxu0 %v917_v8  ;;  %814 = vmatprep.subr.bf16.mxu1 %v935_v22  ;;  %p1038_p2 = pneg %p1037_p1  ;;  %p1043_p12 = scmp.lt.s32.totalorder %s1041_s8, %s1035_s13 }
  0x64   : > { %399 = vmatprep.subr.bf16.mxu0 %v918_v9 }
  0x65   : > { %p1044_p3 = por %p1043_p12, %p1042_p6 }
  0x66   : > { %815 = vmatpush3.bf16.msra.mxu1 %v936_v23 }
  0x67   : > { %400 = vmatpush1.bf16.msra.mxu0 %v920_v10  ;;  %816 = vmatprep.subr.bf16.mxu1 %v937_v24  ;;  %v786_v24 = vld [vmem:[%s1354_s4] ss:$0 sm:$0xff]  ;;  %p1045_p9 = pnand %p1044_p3, %p1038_p2 }
  0x68   : > { %401 = vmatprep.subr.bf16.mxu0 %v921_v11 }
  0x6a   : > { %817 = vmatpush3.bf16.msra.mxu1 %v938_v25 }
  0x6b   : > { %402 = vmatpush1.bf16.msra.mxu0 %v923_v12  ;;  %818 = vmatprep.subr.bf16.mxu1 %v939_v26 }
  0x6c   : > { %403 = vmatprep.subr.bf16.mxu0 %v924_v13 }
  0x6e   : > { %819 = vmatpush3.bf16.msra.mxu1 %v940_v27 }
  0x6f   : > { %404 = vmatpush1.bf16.msra.mxu0 %v926_v14  ;;  %820 = vmatprep.subr.bf16.mxu1 %v941_v28 }
  0x70   : > { %405 = vmatprep.subr.bf16.mxu0 %v927_v15 }
  0x72   : > { %821 = vmatpush3.bf16.msra.mxu1 %v942_v29 }
  0x73   : > { %406 = vmatpush1.bf16.msra.mxu0 %v929_v16  ;;  %822 = vmatprep.subr.bf16.mxu1 %v943_v30 }
  0x76   : > { %424 = vmatmul.mubr.bf16.vlgmr.msra.gmra.mxu0 %v930_v17  ;;  %823 = vmatpush3.bf16.msra.mxu1 %v944_v31 }
  0x77   : > { %824 = vmatprep.subr.bf16.mxu1 %v945_v32 }
  0x7a   : > { %825 = vmatpush3.bf16.msra.mxu1 %v946_v33 }
 0x136   : > { %v425_v41 = vpop.f32.mrf.mxu0 }
 0x137   : > { %v426_v42 = vadd.f32 %v425_v41, %v298_v39 }
 0x138   : > { %v427_v43 = vpop.f32.mrf.mxu0 }
 0x139   : > { %v434_v44 = vmul.f32 %v426_v42, %v426_v42  ;;  %v428_v45 = vadd.f32 %v427_v43, %v302_v40 }
 0x13a   : > { %v429_v46 = vpop.f32.mrf.mxu0 }
 0x13b   : > { %v438_v47 = vmul.f32 %v434_v44, %v426_v42  ;;  %v435_v48 = vmul.f32 %v428_v45, %v428_v45  ;;  %v430_v49 = vadd.f32 %v429_v46, %v298_v39 }
 0x13c   : > { %v431_v50 = vpop.f32.mrf.mxu0 }
 0x13d   : > { %v442_v51 = vmul.f32 0.044715, %v438_v47  ;;  %v439_v52 = vmul.f32 %v435_v48, %v428_v45  ;;  %v436_v53 = vmul.f32 %v430_v49, %v430_v49  ;;  %v432_v54 = vadd.f32 %v431_v50, %v302_v40 }
 0x13f   : > { %v446_v55 = vadd.f32 %v442_v51, %v426_v42  ;;  %v443_v56 = vmul.f32 0.044715, %v439_v52  ;;  %v440_v57 = vmul.f32 %v436_v53, %v430_v49  ;;  %v437_v58 = vmul.f32 %v432_v54, %v432_v54 }
 0x141   : > { %v450_v59 = vmul.f32 0.7978846, %v446_v55  ;;  %v447_v60 = vadd.f32 %v443_v56, %v428_v45  ;;  %v444_v61 = vmul.f32 0.044715, %v440_v57  ;;  %v441_v62 = vmul.f32 %v437_v58, %v432_v54 }
 0x143   : > { %v448_v63 = vadd.f32 %v444_v61, %v430_v49  ;;  %v445_v0 = vmul.f32 0.044715, %v441_v62  ;;  %v451_v1 = vmul.f32 0.7978846, %v447_v60  ;;  %947 = vtanh.f32 %v450_v59 }
 0x145   : > { %v452_v2 = vmul.f32 0.7978846, %v448_v63  ;;  %v449_v3 = vadd.f32 %v445_v0, %v432_v54  ;;  %949 = vtanh.f32 %v451_v1 }
 0x147   : > { %951 = vtanh.f32 %v452_v2  ;;  %v453_v4 = vmul.f32 0.7978846, %v449_v3 }
 0x149   : > { %953 = vtanh.f32 %v453_v4 }
 0x150   : > { %v948_v5 = vpop.eup %947 }
 0x151   : > { %v458_v9 = vadd.f32 1.0, %v948_v5 }
 0x152   : > { %v950_v6 = vpop.eup %949 }
 0x153   : > { %v459_v7 = vadd.f32 1.0, %v950_v6  ;;  %v462_v15 = vmul.f32 0.5, %v458_v9 }
 0x154   : > { %v952_v8 = vpop.eup %951 }
 0x155   : > { %v460_v10 = vadd.f32 1.0, %v952_v8  ;;  %v463_v13 = vmul.f32 0.5, %v459_v7  ;;  %v466_v20 = vmul.f32 %v462_v15, %v426_v42 }
 0x156   : > { %v954_v11 = vpop.eup %953 }
 0x157   : > { %v461_v12 = vadd.f32 1.0, %v954_v11  ;;  %v464_v14 = vmul.f32 0.5, %v460_v10  ;;  %v467_v18 = vmul.f32 %v463_v13, %v428_v45 }
 0x159   : > { %v465_v16 = vmul.f32 0.5, %v461_v12  ;;  %v468_v17 = vmul.f32 %v464_v14, %v430_v49 }
 0x15b   : > { %v469_v19 = vmul.f32 %v465_v16, %v432_v54  ;;  %v470_v22 = vpack.c.bf16 %v468_v17, %v466_v20 }
 0x15d   : > { %v471_v21 = vpack.c.bf16 %v469_v19, %v467_v18 }
 0x15f   : > { %639 = vmatprep.mubr.bf16.mxu1 %v471_v21 }
 0x160   : > { %640 = vmatmul.mubr.bf16.vlgmr.msra.gmra.mxu1 %v470_v22 }
 0x220   : > { %v826_v23 = vpop.f32.mrf.mxu1 }
 0x222   : > { %v827_v25 = vpop.f32.mrf.mxu1 }
 0x223   : > { %v828_v26 = vadd.f32 %v827_v25, %v826_v23 }
 0x224   : > { %v829_v27 = vpop.f32.mrf.mxu1 }
 0x225   : > { %v642_v28 = vadd.f32 %v828_v26, %v786_v24 }
 0x226   : > { %v830_v29 = vpop.f32.mrf.mxu1 }
 0x227   : > { %648 = vst [vmem:[%s271_s15] sm:$0xff] %v642_v28  ;;  %v831_v30 = vadd.f32 %v830_v29, %v829_v27 }
 0x229   : > { %v645_v31 = vadd.f32 %v831_v30, %v786_v24 }
 0x22b   : > { %649 = vst [vmem:[%s271_s15 + $0x8] sm:$0xff] %v645_v31 }
 0x22c   : > { %1048 = shalt.err (!%p1045_p9)
}
 0x22d   : > { %s1049_s24 = scalar_lea.hbm %s1307_s27, 256  ;;  %s1053_s10 = scalar_lea.hbm %s1355_s5, 512 }
 0x22e   : > { %p1050_p13 = scmp.ne.s32.totalorder %s1307_s27, %s1049_s24  ;;  %p1054_p4 = scmp.lt.s32.totalorder %s1307_s27, %s1355_s5 }
 0x22f   : > { %p1055_p8 = scmp.lt.s32.totalorder %s1053_s10, %s1049_s24 }
 0x230   : > { %p1051_p5 = pnand %p1050_p13, %p1373_p10 }
 0x231   : > { %p1056_p7 = por %p1055_p8, %p1054_p4 }
 0x232   : > { %p1052_p0 = pneg %p1051_p5 }
 0x234   : > { %p1057_p11 = pnand %p1056_p7, %p1052_p0 }
 0x236   : > { %1060 = shalt.err (!%p1057_p11)
}
 0x237   : > { %s1114_s9 = smov 128   ;;  %s1115_s30 = smov 8  }
 0x238   : > { %842 = dma.vmem_to_hbm [thread:$0]  (%p1373_p10), %s1302_s16, 256, %s1307_s27, %s651_s23, %s1114_s9, %s1114_s9, %s1115_s30  }
 0x239 PF: > { %s679_s11 = sand.u32 1, %s1091_s18   ;;  %p1374_p1 = scmp.ne.s32.totalorder %s1362_s25, 0 }
 0x23a   : > { %p1375_p2 = scmp.ge.s32.totalorder %s1103_s21, 2  ;;  %s680_s13 = scalar_lea.sflag [#allocation4], %s679_s11 }
 0x23c   : > { %p856_p6 = pnand %p1375_p2, %p1374_p1 }
 0x23e   : > { %p857_p12 = pneg %p856_p6 }
 0x240   : > { %1086 = dma.done.wait (%p857_p12), %s680_s13, 256  }
 0x241   : > { %1088 = vsyncadd (%p857_p12), %s680_s13, 4294967040  ;;  %p19_p3 = scmp.ge.s32.totalorder %s1221_s17, 4   ;;  %s1376_s18 = smov %s1095_s19 }
 0x242   : > { %s1377_s19 = smov %s1099_s20  ;;  %s1378_s20 = smov %s1230_s28 }
 0x243   : > { %s1379_s21 = smov %s1221_s17  ;;  %21 = sbr.rel (!%p19_p3) target bundleno = 6 (0x6), region = 93 }
 0x248   :  { %685 = vsyncpa [#allocation3], 1 }
 0x249   :  { %687 = vsyncpa [#allocation3 + $0x1], 1 }
 0x24a   :  { %688 = vsyncpa [#allocation6], 1 }
 0x24b   :  { %689 = vsyncpa [#allocation4], 1 }
 0x24c   :  { %691 = vsyncpa [#allocation4 + $0x1], 1 }

</bundles_post_ra>
